<compile_context>
chip_gen: v5e
topology: v5e:2x2
jax: 0.10.0
libtpu: 0.0.40
codegen_flags: <defaults>
</compile_context>

<pallas_src>
import functools

import jax
import jax.numpy as jnp
from jax.experimental import pallas as pl
from jax.experimental.pallas import tpu as pltpu

EPS = 1e-5


def _graphnorm_kernel(graph_sizes, offsets, eps,
                      h_hbm, gamma_ref, beta_ref, out_hbm,
                      in_buf, out_buf, in_sem, out_sem):
    """Single grid step; Python-unrolled, double-buffered loop over graphs.

    h_hbm / out_hbm : flat [total_nodes, F] refs left in HBM (pl.ANY)
    gamma_ref/beta_ref : (1, F) VMEM
    in_buf / out_buf   : (2, max_nodes, F) VMEM double buffers
    in_sem / out_sem   : (2,) DMA semaphores
    """
    num_graphs = len(graph_sizes)
    gamma = gamma_ref[...].astype(jnp.float32)        # (1, F)
    beta = beta_ref[...].astype(jnp.float32)          # (1, F)

    in_copies = [None] * num_graphs
    out_copies = [None] * num_graphs

    def start_fetch(i, slot):
        n, off = graph_sizes[i], offsets[i]
        cp = pltpu.make_async_copy(h_hbm.at[pl.ds(off, n), :],
                                   in_buf.at[slot, pl.ds(0, n), :],
                                   in_sem.at[slot])
        cp.start()
        in_copies[i] = cp

    # Prime the pipeline.
    start_fetch(0, 0)

    for i in range(num_graphs):
        slot = i % 2
        # Prefetch next graph into the other slot while we compute this one.
        if i + 1 < num_graphs:
            start_fetch(i + 1, 1 - slot)
        # out_buf[slot] is only reusable once its previous writeback finished.
        if i >= 2:
            out_copies[i - 2].wait()
        in_copies[i].wait()

        n, off = graph_sizes[i], offsets[i]
        x = in_buf[slot, pl.ds(0, n), :].astype(jnp.float32)          # (n, F)

        # Per-feature mean over this graph's nodes.
        mean = jnp.sum(x, axis=0, keepdims=True) * (1.0 / n)          # (1, F)
        d = x - mean
        # Unbiased (N-1) variance; n == 1 yields inf, matching torch.std.
        var = jnp.sum(d * d, axis=0, keepdims=True) / jnp.float32(n - 1)
        std = jnp.sqrt(var)

        # Fold normalization + affine into a single per-element FMA.
        scale = gamma / (std + eps)                                   # (1, F)
        shift = beta - mean * scale                                   # (1, F)
        out_buf[slot, pl.ds(0, n), :] = (x * scale + shift).astype(out_buf.dtype)

        cp = pltpu.make_async_copy(out_buf.at[slot, pl.ds(0, n), :],
                                   out_hbm.at[pl.ds(off, n), :],
                                   out_sem.at[slot])
        cp.start()
        out_copies[i] = cp

    # Drain any output DMAs that have not been waited on yet.
    for i in range(max(0, num_graphs - 2), num_graphs):
        out_copies[i].wait()


def graph_norm_pallas(h, graph_sizes, gamma, beta, eps=EPS):
    """h: [total_nodes, F] float32; graph_sizes: static python list of ints."""
    total_nodes, num_features = h.shape
    graph_sizes = tuple(int(s) for s in graph_sizes)
    assert sum(graph_sizes) == total_nodes
    max_nodes = max(graph_sizes)

    offsets = []
    off = 0
    for s in graph_sizes:
        offsets.append(off)
        off += s
    offsets = tuple(offsets)

    gamma2 = gamma.reshape(1, num_features).astype(h.dtype)
    beta2 = beta.reshape(1, num_features).astype(h.dtype)

    kernel = functools.partial(_graphnorm_kernel, graph_sizes, offsets, eps)

    return pl.pallas_call(
        kernel,
        out_shape=jax.ShapeDtypeStruct((total_nodes, num_features), h.dtype),
        grid_spec=pltpu.PrefetchScalarGridSpec(
            num_scalar_prefetch=0,
            grid=(1,),
            in_specs=[
                pl.BlockSpec(memory_space=pl.ANY),                    # h (flat, HBM)
                pl.BlockSpec((1, num_features), lambda i: (0, 0)),    # gamma
                pl.BlockSpec((1, num_features), lambda i: (0, 0)),    # beta
            ],
            out_specs=pl.BlockSpec(memory_space=pl.ANY),              # out (flat, HBM)
            scratch_shapes=[
                pltpu.VMEM((2, max_nodes, num_features), h.dtype),    # input double-buffer
                pltpu.VMEM((2, max_nodes, num_features), h.dtype),    # output double-buffer
                pltpu.SemaphoreType.DMA((2,)),                        # input DMA sems
                pltpu.SemaphoreType.DMA((2,)),                        # output DMA sems
            ],
        ),
        compiler_params=pltpu.CompilerParams(
            dimension_semantics=("arbitrary",)),
    )(h, gamma2, beta2)


def _reference(h, graph_sizes, gamma, beta, eps=EPS):
    offsets = [0]
    for s in graph_sizes:
        offsets.append(offsets[-1] + s)
    outs = []
    for i, s in enumerate(graph_sizes):
        x = h[offsets[i]:offsets[i] + s]
        mean = jnp.mean(x, axis=0, keepdims=True)
        std = jnp.std(x, axis=0, keepdims=True, ddof=1)
        outs.append((x - mean) / (std + eps))
    normed = jnp.concatenate(outs, axis=0)
    return gamma[None, :] * normed + beta[None, :]


if __name__ == "__main__":
    key = jax.random.PRNGKey(0)
    num_features = 128                 # lane-dense feature axis
    graph_sizes = [5, 8, 3]            # batched-graph node counts (static)
    total_nodes = sum(graph_sizes)

    h = jax.random.normal(key, (total_nodes, num_features), dtype=jnp.float32)
    # deterministic parameter init per nn.Module.__init__ (affine=True)
    gamma = jnp.ones((num_features,), dtype=jnp.float32)
    beta = jnp.zeros((num_features,), dtype=jnp.float32)

    out = graph_norm_pallas(h, graph_sizes, gamma, beta)
    out = jax.block_until_ready(out)

    ref = _reference(h, graph_sizes, gamma, beta)
    assert out.shape == ref.shape
    assert jnp.allclose(out, ref, rtol=1e-4, atol=1e-4)

    print("KERNEL_OK")
</pallas_src>

<mosaic_0001>
module attributes {stable_mosaic.version = 11 : i64} {
  func.func @_graphnorm_kernel(%arg0: i32, %arg1: memref<16x128xf32, #tpu.memory_space<any>>, %arg2: memref<1x128xf32, #tpu.memory_space<vmem>>, %arg3: memref<1x128xf32, #tpu.memory_space<vmem>>, %arg4: memref<16x128xf32, #tpu.memory_space<any>>, %arg5: memref<2x8x128xf32, #tpu.memory_space<vmem>>, %arg6: memref<2x8x128xf32, #tpu.memory_space<vmem>>, %arg7: memref<2x!tpu.dma_semaphore, #tpu.memory_space<semaphore_mem>>, %arg8: memref<2x!tpu.dma_semaphore, #tpu.memory_space<semaphore_mem>>) attributes {dimension_semantics = [#tpu.dimension_semantics<arbitrary>], iteration_bounds = array<i64: 1>, scalar_prefetch = 0 : i64, scratch_operands = 4 : i64, tpu.core_type = #tpu.core_type<tc>, window_params = [{}, {pipeline_mode = #tpu.pipeline_mode<synchronous>, transform_indices = @transform_1, window_bounds = array<i64: 1, 128>}, {pipeline_mode = #tpu.pipeline_mode<synchronous>, transform_indices = @transform_2, window_bounds = array<i64: 1, 128>}, {}]} {
    %c0 = arith.constant 0 : index
    %c0_0 = arith.constant 0 : index
    %0 = vector.load %arg2[%c0, %c0_0] : memref<1x128xf32, #tpu.memory_space<vmem>>, vector<1x128xf32>
    %c0_1 = arith.constant 0 : index
    %c0_2 = arith.constant 0 : index
    %1 = vector.load %arg3[%c0_1, %c0_2] : memref<1x128xf32, #tpu.memory_space<vmem>>, vector<1x128xf32>
    %c0_i32 = arith.constant 0 : i32
    %c0_i32_3 = arith.constant 0 : i32
    %c0_i32_4 = arith.constant 0 : i32
    %c0_i32_5 = arith.constant 0 : i32
    %2 = tpu.memref_slice %arg1[%c0_i32_4, %c0_i32_5] : memref<16x128xf32, #tpu.memory_space<any>> -> memref<5x128xf32, #tpu.memory_space<any>>
    %c0_i32_6 = arith.constant 0 : i32
    %c0_i32_7 = arith.constant 0 : i32
    %3 = tpu.memref_slice %arg5[%c0_i32, %c0_i32_6, %c0_i32_7] : memref<2x8x128xf32, #tpu.memory_space<vmem>> -> memref<1x5x128xf32, #tpu.memory_space<vmem>>
    %4 = tpu.memref_squeeze %3 : memref<1x5x128xf32, #tpu.memory_space<vmem>> -> memref<5x128xf32, #tpu.memory_space<vmem>>
    %5 = tpu.memref_slice %arg7[%c0_i32_3] : memref<2x!tpu.dma_semaphore, #tpu.memory_space<semaphore_mem>> -> memref<1x!tpu.dma_semaphore, #tpu.memory_space<semaphore_mem>>
    %6 = tpu.memref_squeeze %5 : memref<1x!tpu.dma_semaphore, #tpu.memory_space<semaphore_mem>> -> memref<!tpu.dma_semaphore, #tpu.memory_space<semaphore_mem>>
    tpu.enqueue_dma source(%2 : memref<5x128xf32, #tpu.memory_space<any>>) target(%4 : memref<5x128xf32, #tpu.memory_space<vmem>>) target_semaphore(%6 : memref<!tpu.dma_semaphore, #tpu.memory_space<semaphore_mem>>)
    %c1_i32 = arith.constant 1 : i32
    %c1_i32_8 = arith.constant 1 : i32
    %c5_i32 = arith.constant 5 : i32
    %c0_i32_9 = arith.constant 0 : i32
    %7 = tpu.memref_slice %arg1[%c5_i32, %c0_i32_9] : memref<16x128xf32, #tpu.memory_space<any>> -> memref<8x128xf32, #tpu.memory_space<any>>
    %c0_i32_10 = arith.constant 0 : i32
    %c0_i32_11 = arith.constant 0 : i32
    %8 = tpu.memref_slice %arg5[%c1_i32, %c0_i32_10, %c0_i32_11] : memref<2x8x128xf32, #tpu.memory_space<vmem>> -> memref<1x8x128xf32, #tpu.memory_space<vmem>>
    %9 = tpu.memref_squeeze %8 : memref<1x8x128xf32, #tpu.memory_space<vmem>> -> memref<8x128xf32, #tpu.memory_space<vmem>>
    %10 = tpu.memref_slice %arg7[%c1_i32_8] : memref<2x!tpu.dma_semaphore, #tpu.memory_space<semaphore_mem>> -> memref<1x!tpu.dma_semaphore, #tpu.memory_space<semaphore_mem>>
    %11 = tpu.memref_squeeze %10 : memref<1x!tpu.dma_semaphore, #tpu.memory_space<semaphore_mem>> -> memref<!tpu.dma_semaphore, #tpu.memory_space<semaphore_mem>>
    tpu.enqueue_dma source(%7 : memref<8x128xf32, #tpu.memory_space<any>>) target(%9 : memref<8x128xf32, #tpu.memory_space<vmem>>) target_semaphore(%11 : memref<!tpu.dma_semaphore, #tpu.memory_space<semaphore_mem>>)
    %c0_i32_12 = arith.constant 0 : i32
    %c0_i32_13 = arith.constant 0 : i32
    %c0_i32_14 = arith.constant 0 : i32
    %c0_i32_15 = arith.constant 0 : i32
    %12 = tpu.memref_slice %arg1[%c0_i32_14, %c0_i32_15] : memref<16x128xf32, #tpu.memory_space<any>> -> memref<5x128xf32, #tpu.memory_space<any>>
    %c0_i32_16 = arith.constant 0 : i32
    %c0_i32_17 = arith.constant 0 : i32
    %13 = tpu.memref_slice %arg5[%c0_i32_12, %c0_i32_16, %c0_i32_17] : memref<2x8x128xf32, #tpu.memory_space<vmem>> -> memref<1x5x128xf32, #tpu.memory_space<vmem>>
    %14 = tpu.memref_squeeze %13 : memref<1x5x128xf32, #tpu.memory_space<vmem>> -> memref<5x128xf32, #tpu.memory_space<vmem>>
    %15 = tpu.memref_slice %arg7[%c0_i32_13] : memref<2x!tpu.dma_semaphore, #tpu.memory_space<semaphore_mem>> -> memref<1x!tpu.dma_semaphore, #tpu.memory_space<semaphore_mem>>
    %16 = tpu.memref_squeeze %15 : memref<1x!tpu.dma_semaphore, #tpu.memory_space<semaphore_mem>> -> memref<!tpu.dma_semaphore, #tpu.memory_space<semaphore_mem>>
    tpu.wait_dma2 semaphore(%16 : memref<!tpu.dma_semaphore, #tpu.memory_space<semaphore_mem>>) src(%12 : memref<5x128xf32, #tpu.memory_space<any>>) dst(%14 : memref<5x128xf32, #tpu.memory_space<vmem>>)
    %c0_18 = arith.constant 0 : index
    %c0_19 = arith.constant 0 : index
    %c0_20 = arith.constant 0 : index
    %17 = vector.load %arg5[%c0_18, %c0_19, %c0_20] : memref<2x8x128xf32, #tpu.memory_space<vmem>>, vector<1x5x128xf32>
    %18 = vector.shape_cast %17 : vector<1x5x128xf32> to vector<5x128xf32>
    %cst = arith.constant dense<0.000000e+00> : vector<128xf32>
    %19 = vector.multi_reduction <add>, %18, %cst [0] : vector<5x128xf32> to vector<128xf32>
    %20 = vector.shape_cast %19 : vector<128xf32> to vector<1x128xf32>
    %cst_21 = arith.constant 2.000000e-01 : f32
    %21 = vector.broadcast %cst_21 : f32 to vector<1x128xf32>
    %22 = arith.mulf %20, %21 : vector<1x128xf32>
    %23 = vector.broadcast %22 : vector<1x128xf32> to vector<5x128xf32>
    %24 = arith.subf %18, %23 : vector<5x128xf32>
    %25 = arith.mulf %24, %24 : vector<5x128xf32>
    %cst_22 = arith.constant dense<0.000000e+00> : vector<128xf32>
    %26 = vector.multi_reduction <add>, %25, %cst_22 [0] : vector<5x128xf32> to vector<128xf32>
    %27 = vector.shape_cast %26 : vector<128xf32> to vector<1x128xf32>
    %cst_23 = arith.constant 4.000000e+00 : f32
    %28 = vector.broadcast %cst_23 : f32 to vector<1x128xf32>
    %29 = arith.divf %27, %28 : vector<1x128xf32>
    %30 = math.sqrt %29 : vector<1x128xf32>
    %cst_24 = arith.constant 9.99999974E-6 : f32
    %31 = vector.broadcast %cst_24 : f32 to vector<1x128xf32>
    %32 = arith.addf %30, %31 : vector<1x128xf32>
    %33 = arith.divf %0, %32 : vector<1x128xf32>
    %34 = arith.mulf %22, %33 : vector<1x128xf32>
    %35 = arith.subf %1, %34 : vector<1x128xf32>
    %36 = vector.broadcast %33 : vector<1x128xf32> to vector<5x128xf32>
    %37 = arith.mulf %18, %36 : vector<5x128xf32>
    %38 = vector.broadcast %35 : vector<1x128xf32> to vector<5x128xf32>
    %39 = arith.addf %37, %38 : vector<5x128xf32>
    %c0_25 = arith.constant 0 : index
    %c0_26 = arith.constant 0 : index
    %c0_27 = arith.constant 0 : index
    %40 = vector.load %arg6[%c0_25, %c0_26, %c0_27] : memref<2x8x128xf32, #tpu.memory_space<vmem>>, vector<1x5x128xf32>
    %41 = vector.shape_cast %40 : vector<1x5x128xf32> to vector<5x128xf32>
    %42 = vector.shape_cast %39 : vector<5x128xf32> to vector<1x5x128xf32>
    tpu.vector_store %arg6[%c0_25, %c0_26, %c0_27], %42 {strides = array<i32>} : memref<2x8x128xf32, #tpu.memory_space<vmem>>, vector<1x5x128xf32>,
    %c0_i32_28 = arith.constant 0 : i32
    %c0_i32_29 = arith.constant 0 : i32
    %c0_i32_30 = arith.constant 0 : i32
    %c0_i32_31 = arith.constant 0 : i32
    %43 = tpu.memref_slice %arg6[%c0_i32_28, %c0_i32_30, %c0_i32_31] : memref<2x8x128xf32, #tpu.memory_space<vmem>> -> memref<1x5x128xf32, #tpu.memory_space<vmem>>
    %44 = tpu.memref_squeeze %43 : memref<1x5x128xf32, #tpu.memory_space<vmem>> -> memref<5x128xf32, #tpu.memory_space<vmem>>
    %c0_i32_32 = arith.constant 0 : i32
    %c0_i32_33 = arith.constant 0 : i32
    %45 = tpu.memref_slice %arg4[%c0_i32_32, %c0_i32_33] : memref<16x128xf32, #tpu.memory_space<any>> -> memref<5x128xf32, #tpu.memory_space<any>>
    %46 = tpu.memref_slice %arg8[%c0_i32_29] : memref<2x!tpu.dma_semaphore, #tpu.memory_space<semaphore_mem>> -> memref<1x!tpu.dma_semaphore, #tpu.memory_space<semaphore_mem>>
    %47 = tpu.memref_squeeze %46 : memref<1x!tpu.dma_semaphore, #tpu.memory_space<semaphore_mem>> -> memref<!tpu.dma_semaphore, #tpu.memory_space<semaphore_mem>>
    tpu.enqueue_dma source(%44 : memref<5x128xf32, #tpu.memory_space<vmem>>) target(%45 : memref<5x128xf32, #tpu.memory_space<any>>) target_semaphore(%47 : memref<!tpu.dma_semaphore, #tpu.memory_space<semaphore_mem>>)
    %c0_i32_34 = arith.constant 0 : i32
    %c0_i32_35 = arith.constant 0 : i32
    %c13_i32 = arith.constant 13 : i32
    %c0_i32_36 = arith.constant 0 : i32
    %48 = tpu.memref_slice %arg1[%c13_i32, %c0_i32_36] : memref<16x128xf32, #tpu.memory_space<any>> -> memref<3x128xf32, #tpu.memory_space<any>>
    %c0_i32_37 = arith.constant 0 : i32
    %c0_i32_38 = arith.constant 0 : i32
    %49 = tpu.memref_slice %arg5[%c0_i32_34, %c0_i32_37, %c0_i32_38] : memref<2x8x128xf32, #tpu.memory_space<vmem>> -> memref<1x3x128xf32, #tpu.memory_space<vmem>>
    %50 = tpu.memref_squeeze %49 : memref<1x3x128xf32, #tpu.memory_space<vmem>> -> memref<3x128xf32, #tpu.memory_space<vmem>>
    %51 = tpu.memref_slice %arg7[%c0_i32_35] : memref<2x!tpu.dma_semaphore, #tpu.memory_space<semaphore_mem>> -> memref<1x!tpu.dma_semaphore, #tpu.memory_space<semaphore_mem>>
    %52 = tpu.memref_squeeze %51 : memref<1x!tpu.dma_semaphore, #tpu.memory_space<semaphore_mem>> -> memref<!tpu.dma_semaphore, #tpu.memory_space<semaphore_mem>>
    tpu.enqueue_dma source(%48 : memref<3x128xf32, #tpu.memory_space<any>>) target(%50 : memref<3x128xf32, #tpu.memory_space<vmem>>) target_semaphore(%52 : memref<!tpu.dma_semaphore, #tpu.memory_space<semaphore_mem>>)
    %c1_i32_39 = arith.constant 1 : i32
    %c1_i32_40 = arith.constant 1 : i32
    %c5_i32_41 = arith.constant 5 : i32
    %c0_i32_42 = arith.constant 0 : i32
    %53 = tpu.memref_slice %arg1[%c5_i32_41, %c0_i32_42] : memref<16x128xf32, #tpu.memory_space<any>> -> memref<8x128xf32, #tpu.memory_space<any>>
    %c0_i32_43 = arith.constant 0 : i32
    %c0_i32_44 = arith.constant 0 : i32
    %54 = tpu.memref_slice %arg5[%c1_i32_39, %c0_i32_43, %c0_i32_44] : memref<2x8x128xf32, #tpu.memory_space<vmem>> -> memref<1x8x128xf32, #tpu.memory_space<vmem>>
    %55 = tpu.memref_squeeze %54 : memref<1x8x128xf32, #tpu.memory_space<vmem>> -> memref<8x128xf32, #tpu.memory_space<vmem>>
    %56 = tpu.memref_slice %arg7[%c1_i32_40] : memref<2x!tpu.dma_semaphore, #tpu.memory_space<semaphore_mem>> -> memref<1x!tpu.dma_semaphore, #tpu.memory_space<semaphore_mem>>
    %57 = tpu.memref_squeeze %56 : memref<1x!tpu.dma_semaphore, #tpu.memory_space<semaphore_mem>> -> memref<!tpu.dma_semaphore, #tpu.memory_space<semaphore_mem>>
    tpu.wait_dma2 semaphore(%57 : memref<!tpu.dma_semaphore, #tpu.memory_space<semaphore_mem>>) src(%53 : memref<8x128xf32, #tpu.memory_space<any>>) dst(%55 : memref<8x128xf32, #tpu.memory_space<vmem>>)
    %c1 = arith.constant 1 : index
    %c0_45 = arith.constant 0 : index
    %c0_46 = arith.constant 0 : index
    %58 = vector.load %arg5[%c1, %c0_45, %c0_46] : memref<2x8x128xf32, #tpu.memory_space<vmem>>, vector<1x8x128xf32>
    %59 = vector.shape_cast %58 : vector<1x8x128xf32> to vector<8x128xf32>
    %cst_47 = arith.constant dense<0.000000e+00> : vector<128xf32>
    %60 = vector.multi_reduction <add>, %59, %cst_47 [0] : vector<8x128xf32> to vector<128xf32>
    %61 = vector.shape_cast %60 : vector<128xf32> to vector<1x128xf32>
    %cst_48 = arith.constant 1.250000e-01 : f32
    %62 = vector.broadcast %cst_48 : f32 to vector<1x128xf32>
    %63 = arith.mulf %61, %62 : vector<1x128xf32>
    %64 = vector.broadcast %63 : vector<1x128xf32> to vector<8x128xf32>
    %65 = arith.subf %59, %64 : vector<8x128xf32>
    %66 = arith.mulf %65, %65 : vector<8x128xf32>
    %cst_49 = arith.constant dense<0.000000e+00> : vector<128xf32>
    %67 = vector.multi_reduction <add>, %66, %cst_49 [0] : vector<8x128xf32> to vector<128xf32>
    %68 = vector.shape_cast %67 : vector<128xf32> to vector<1x128xf32>
    %cst_50 = arith.constant 7.000000e+00 : f32
    %69 = vector.broadcast %cst_50 : f32 to vector<1x128xf32>
    %70 = arith.divf %68, %69 : vector<1x128xf32>
    %71 = math.sqrt %70 : vector<1x128xf32>
    %cst_51 = arith.constant 9.99999974E-6 : f32
    %72 = vector.broadcast %cst_51 : f32 to vector<1x128xf32>
    %73 = arith.addf %71, %72 : vector<1x128xf32>
    %74 = arith.divf %0, %73 : vector<1x128xf32>
    %75 = arith.mulf %63, %74 : vector<1x128xf32>
    %76 = arith.subf %1, %75 : vector<1x128xf32>
    %77 = vector.broadcast %74 : vector<1x128xf32> to vector<8x128xf32>
    %78 = arith.mulf %59, %77 : vector<8x128xf32>
    %79 = vector.broadcast %76 : vector<1x128xf32> to vector<8x128xf32>
    %80 = arith.addf %78, %79 : vector<8x128xf32>
    %c1_52 = arith.constant 1 : index
    %c0_53 = arith.constant 0 : index
    %c0_54 = arith.constant 0 : index
    %81 = vector.load %arg6[%c1_52, %c0_53, %c0_54] : memref<2x8x128xf32, #tpu.memory_space<vmem>>, vector<1x8x128xf32>
    %82 = vector.shape_cast %81 : vector<1x8x128xf32> to vector<8x128xf32>
    %83 = vector.shape_cast %80 : vector<8x128xf32> to vector<1x8x128xf32>
    tpu.vector_store %arg6[%c1_52, %c0_53, %c0_54], %83 {strides = array<i32>} : memref<2x8x128xf32, #tpu.memory_space<vmem>>, vector<1x8x128xf32>,
    %c1_i32_55 = arith.constant 1 : i32
    %c1_i32_56 = arith.constant 1 : i32
    %c0_i32_57 = arith.constant 0 : i32
    %c0_i32_58 = arith.constant 0 : i32
    %84 = tpu.memref_slice %arg6[%c1_i32_55, %c0_i32_57, %c0_i32_58] : memref<2x8x128xf32, #tpu.memory_space<vmem>> -> memref<1x8x128xf32, #tpu.memory_space<vmem>>
    %85 = tpu.memref_squeeze %84 : memref<1x8x128xf32, #tpu.memory_space<vmem>> -> memref<8x128xf32, #tpu.memory_space<vmem>>
    %c5_i32_59 = arith.constant 5 : i32
    %c0_i32_60 = arith.constant 0 : i32
    %86 = tpu.memref_slice %arg4[%c5_i32_59, %c0_i32_60] : memref<16x128xf32, #tpu.memory_space<any>> -> memref<8x128xf32, #tpu.memory_space<any>>
    %87 = tpu.memref_slice %arg8[%c1_i32_56] : memref<2x!tpu.dma_semaphore, #tpu.memory_space<semaphore_mem>> -> memref<1x!tpu.dma_semaphore, #tpu.memory_space<semaphore_mem>>
    %88 = tpu.memref_squeeze %87 : memref<1x!tpu.dma_semaphore, #tpu.memory_space<semaphore_mem>> -> memref<!tpu.dma_semaphore, #tpu.memory_space<semaphore_mem>>
    tpu.enqueue_dma source(%85 : memref<8x128xf32, #tpu.memory_space<vmem>>) target(%86 : memref<8x128xf32, #tpu.memory_space<any>>) target_semaphore(%88 : memref<!tpu.dma_semaphore, #tpu.memory_space<semaphore_mem>>)
    %c0_i32_61 = arith.constant 0 : i32
    %c0_i32_62 = arith.constant 0 : i32
    %c0_i32_63 = arith.constant 0 : i32
    %c0_i32_64 = arith.constant 0 : i32
    %89 = tpu.memref_slice %arg6[%c0_i32_61, %c0_i32_63, %c0_i32_64] : memref<2x8x128xf32, #tpu.memory_space<vmem>> -> memref<1x5x128xf32, #tpu.memory_space<vmem>>
    %90 = tpu.memref_squeeze %89 : memref<1x5x128xf32, #tpu.memory_space<vmem>> -> memref<5x128xf32, #tpu.memory_space<vmem>>
    %c0_i32_65 = arith.constant 0 : i32
    %c0_i32_66 = arith.constant 0 : i32
    %91 = tpu.memref_slice %arg4[%c0_i32_65, %c0_i32_66] : memref<16x128xf32, #tpu.memory_space<any>> -> memref<5x128xf32, #tpu.memory_space<any>>
    %92 = tpu.memref_slice %arg8[%c0_i32_62] : memref<2x!tpu.dma_semaphore, #tpu.memory_space<semaphore_mem>> -> memref<1x!tpu.dma_semaphore, #tpu.memory_space<semaphore_mem>>
    %93 = tpu.memref_squeeze %92 : memref<1x!tpu.dma_semaphore, #tpu.memory_space<semaphore_mem>> -> memref<!tpu.dma_semaphore, #tpu.memory_space<semaphore_mem>>
    tpu.wait_dma2 semaphore(%93 : memref<!tpu.dma_semaphore, #tpu.memory_space<semaphore_mem>>) src(%90 : memref<5x128xf32, #tpu.memory_space<vmem>>) dst(%91 : memref<5x128xf32, #tpu.memory_space<any>>)
    %c0_i32_67 = arith.constant 0 : i32
    %c0_i32_68 = arith.constant 0 : i32
    %c13_i32_69 = arith.constant 13 : i32
    %c0_i32_70 = arith.constant 0 : i32
    %94 = tpu.memref_slice %arg1[%c13_i32_69, %c0_i32_70] : memref<16x128xf32, #tpu.memory_space<any>> -> memref<3x128xf32, #tpu.memory_space<any>>
    %c0_i32_71 = arith.constant 0 : i32
    %c0_i32_72 = arith.constant 0 : i32
    %95 = tpu.memref_slice %arg5[%c0_i32_67, %c0_i32_71, %c0_i32_72] : memref<2x8x128xf32, #tpu.memory_space<vmem>> -> memref<1x3x128xf32, #tpu.memory_space<vmem>>
    %96 = tpu.memref_squeeze %95 : memref<1x3x128xf32, #tpu.memory_space<vmem>> -> memref<3x128xf32, #tpu.memory_space<vmem>>
    %97 = tpu.memref_slice %arg7[%c0_i32_68] : memref<2x!tpu.dma_semaphore, #tpu.memory_space<semaphore_mem>> -> memref<1x!tpu.dma_semaphore, #tpu.memory_space<semaphore_mem>>
    %98 = tpu.memref_squeeze %97 : memref<1x!tpu.dma_semaphore, #tpu.memory_space<semaphore_mem>> -> memref<!tpu.dma_semaphore, #tpu.memory_space<semaphore_mem>>
    tpu.wait_dma2 semaphore(%98 : memref<!tpu.dma_semaphore, #tpu.memory_space<semaphore_mem>>) src(%94 : memref<3x128xf32, #tpu.memory_space<any>>) dst(%96 : memref<3x128xf32, #tpu.memory_space<vmem>>)
    %c0_73 = arith.constant 0 : index
    %c0_74 = arith.constant 0 : index
    %c0_75 = arith.constant 0 : index
    %99 = vector.load %arg5[%c0_73, %c0_74, %c0_75] : memref<2x8x128xf32, #tpu.memory_space<vmem>>, vector<1x3x128xf32>
    %100 = vector.shape_cast %99 : vector<1x3x128xf32> to vector<3x128xf32>
    %cst_76 = arith.constant dense<0.000000e+00> : vector<128xf32>
    %101 = vector.multi_reduction <add>, %100, %cst_76 [0] : vector<3x128xf32> to vector<128xf32>
    %102 = vector.shape_cast %101 : vector<128xf32> to vector<1x128xf32>
    %cst_77 = arith.constant 0.333333343 : f32
    %103 = vector.broadcast %cst_77 : f32 to vector<1x128xf32>
    %104 = arith.mulf %102, %103 : vector<1x128xf32>
    %105 = vector.broadcast %104 : vector<1x128xf32> to vector<3x128xf32>
    %106 = arith.subf %100, %105 : vector<3x128xf32>
    %107 = arith.mulf %106, %106 : vector<3x128xf32>
    %cst_78 = arith.constant dense<0.000000e+00> : vector<128xf32>
    %108 = vector.multi_reduction <add>, %107, %cst_78 [0] : vector<3x128xf32> to vector<128xf32>
    %109 = vector.shape_cast %108 : vector<128xf32> to vector<1x128xf32>
    %cst_79 = arith.constant 2.000000e+00 : f32
    %110 = vector.broadcast %cst_79 : f32 to vector<1x128xf32>
    %111 = arith.divf %109, %110 : vector<1x128xf32>
    %112 = math.sqrt %111 : vector<1x128xf32>
    %cst_80 = arith.constant 9.99999974E-6 : f32
    %113 = vector.broadcast %cst_80 : f32 to vector<1x128xf32>
    %114 = arith.addf %112, %113 : vector<1x128xf32>
    %115 = arith.divf %0, %114 : vector<1x128xf32>
    %116 = arith.mulf %104, %115 : vector<1x128xf32>
    %117 = arith.subf %1, %116 : vector<1x128xf32>
    %118 = vector.broadcast %115 : vector<1x128xf32> to vector<3x128xf32>
    %119 = arith.mulf %100, %118 : vector<3x128xf32>
    %120 = vector.broadcast %117 : vector<1x128xf32> to vector<3x128xf32>
    %121 = arith.addf %119, %120 : vector<3x128xf32>
    %c0_81 = arith.constant 0 : index
    %c0_82 = arith.constant 0 : index
    %c0_83 = arith.constant 0 : index
    %122 = vector.load %arg6[%c0_81, %c0_82, %c0_83] : memref<2x8x128xf32, #tpu.memory_space<vmem>>, vector<1x3x128xf32>
    %123 = vector.shape_cast %122 : vector<1x3x128xf32> to vector<3x128xf32>
    %124 = vector.shape_cast %121 : vector<3x128xf32> to vector<1x3x128xf32>
    tpu.vector_store %arg6[%c0_81, %c0_82, %c0_83], %124 {strides = array<i32>} : memref<2x8x128xf32, #tpu.memory_space<vmem>>, vector<1x3x128xf32>,
    %c0_i32_84 = arith.constant 0 : i32
    %c0_i32_85 = arith.constant 0 : i32
    %c0_i32_86 = arith.constant 0 : i32
    %c0_i32_87 = arith.constant 0 : i32
    %125 = tpu.memref_slice %arg6[%c0_i32_84, %c0_i32_86, %c0_i32_87] : memref<2x8x128xf32, #tpu.memory_space<vmem>> -> memref<1x3x128xf32, #tpu.memory_space<vmem>>
    %126 = tpu.memref_squeeze %125 : memref<1x3x128xf32, #tpu.memory_space<vmem>> -> memref<3x128xf32, #tpu.memory_space<vmem>>
    %c13_i32_88 = arith.constant 13 : i32
    %c0_i32_89 = arith.constant 0 : i32
    %127 = tpu.memref_slice %arg4[%c13_i32_88, %c0_i32_89] : memref<16x128xf32, #tpu.memory_space<any>> -> memref<3x128xf32, #tpu.memory_space<any>>
    %128 = tpu.memref_slice %arg8[%c0_i32_85] : memref<2x!tpu.dma_semaphore, #tpu.memory_space<semaphore_mem>> -> memref<1x!tpu.dma_semaphore, #tpu.memory_space<semaphore_mem>>
    %129 = tpu.memref_squeeze %128 : memref<1x!tpu.dma_semaphore, #tpu.memory_space<semaphore_mem>> -> memref<!tpu.dma_semaphore, #tpu.memory_space<semaphore_mem>>
    tpu.enqueue_dma source(%126 : memref<3x128xf32, #tpu.memory_space<vmem>>) target(%127 : memref<3x128xf32, #tpu.memory_space<any>>) target_semaphore(%129 : memref<!tpu.dma_semaphore, #tpu.memory_space<semaphore_mem>>)
    %c1_i32_90 = arith.constant 1 : i32
    %c1_i32_91 = arith.constant 1 : i32
    %c0_i32_92 = arith.constant 0 : i32
    %c0_i32_93 = arith.constant 0 : i32
    %130 = tpu.memref_slice %arg6[%c1_i32_90, %c0_i32_92, %c0_i32_93] : memref<2x8x128xf32, #tpu.memory_space<vmem>> -> memref<1x8x128xf32, #tpu.memory_space<vmem>>
    %131 = tpu.memref_squeeze %130 : memref<1x8x128xf32, #tpu.memory_space<vmem>> -> memref<8x128xf32, #tpu.memory_space<vmem>>
    %c5_i32_94 = arith.constant 5 : i32
    %c0_i32_95 = arith.constant 0 : i32
    %132 = tpu.memref_slice %arg4[%c5_i32_94, %c0_i32_95] : memref<16x128xf32, #tpu.memory_space<any>> -> memref<8x128xf32, #tpu.memory_space<any>>
    %133 = tpu.memref_slice %arg8[%c1_i32_91] : memref<2x!tpu.dma_semaphore, #tpu.memory_space<semaphore_mem>> -> memref<1x!tpu.dma_semaphore, #tpu.memory_space<semaphore_mem>>
    %134 = tpu.memref_squeeze %133 : memref<1x!tpu.dma_semaphore, #tpu.memory_space<semaphore_mem>> -> memref<!tpu.dma_semaphore, #tpu.memory_space<semaphore_mem>>
    tpu.wait_dma2 semaphore(%134 : memref<!tpu.dma_semaphore, #tpu.memory_space<semaphore_mem>>) src(%131 : memref<8x128xf32, #tpu.memory_space<vmem>>) dst(%132 : memref<8x128xf32, #tpu.memory_space<any>>)
    %c0_i32_96 = arith.constant 0 : i32
    %c0_i32_97 = arith.constant 0 : i32
    %c0_i32_98 = arith.constant 0 : i32
    %c0_i32_99 = arith.constant 0 : i32
    %135 = tpu.memref_slice %arg6[%c0_i32_96, %c0_i32_98, %c0_i32_99] : memref<2x8x128xf32, #tpu.memory_space<vmem>> -> memref<1x3x128xf32, #tpu.memory_space<vmem>>
    %136 = tpu.memref_squeeze %135 : memref<1x3x128xf32, #tpu.memory_space<vmem>> -> memref<3x128xf32, #tpu.memory_space<vmem>>
    %c13_i32_100 = arith.constant 13 : i32
    %c0_i32_101 = arith.constant 0 : i32
    %137 = tpu.memref_slice %arg4[%c13_i32_100, %c0_i32_101] : memref<16x128xf32, #tpu.memory_space<any>> -> memref<3x128xf32, #tpu.memory_space<any>>
    %138 = tpu.memref_slice %arg8[%c0_i32_97] : memref<2x!tpu.dma_semaphore, #tpu.memory_space<semaphore_mem>> -> memref<1x!tpu.dma_semaphore, #tpu.memory_space<semaphore_mem>>
    %139 = tpu.memref_squeeze %138 : memref<1x!tpu.dma_semaphore, #tpu.memory_space<semaphore_mem>> -> memref<!tpu.dma_semaphore, #tpu.memory_space<semaphore_mem>>
    tpu.wait_dma2 semaphore(%139 : memref<!tpu.dma_semaphore, #tpu.memory_space<semaphore_mem>>) src(%136 : memref<3x128xf32, #tpu.memory_space<vmem>>) dst(%137 : memref<3x128xf32, #tpu.memory_space<any>>)
    return
  }
  func.func @transform_1(%arg0: i32) -> (i32, i32) {
    %c0_i32 = arith.constant 0 : i32
    %c0_i32_0 = arith.constant 0 : i32
    %c0_i32_1 = arith.constant 0 : i32
    return %c0_i32, %c0_i32_0 : i32, i32
  }
  func.func @transform_2(%arg0: i32) -> (i32, i32) {
    %c0_i32 = arith.constant 0 : i32
    %c0_i32_0 = arith.constant 0 : i32
    %c0_i32_1 = arith.constant 0 : i32
    return %c0_i32, %c0_i32_0 : i32, i32
  }
}

</mosaic_0001>

<bundles_post_ra>
// kernel: tpu_custom_call.1
= control target key start
LH: loop header
LB: loop body
LE: loop exit
PB: predicated region body
PF: predicated region fallthrough
CT: control target
= control target key end

     0   :  { %8 = vsyncpa [#allocation7], 0  ;;  %s563_s15 = smov [#allocation6]   ;;  %s636_s0 = inlined_call_operand.hbm [shape: f32[16,128], index: 0, kind: input, shape index: {}]   ;;  %s637_s1 = inlined_call_operand.hbm [shape: f32[1,128], index: 1, kind: input, shape index: {}]   ;;  %s638_s2 = inlined_call_operand.vmem [shape: f32[1,128], index: 2, kind: input, shape index: {}]   ;;  %s639_s3 = inlined_call_operand.hbm [shape: f32[16,128], index: 3, kind: output, shape index: {}]  }
   0x1   :  { %s14_s14 = sshll.u32 %s637_s1, 4  ;;  %s16_s16 = sshll.u32 %s563_s15, 4  ;;  %s15_s14 = int_to_ptr.hbm [resolvable:$true] %s14_s14  ;;  %s17_s16 = int_to_ptr.vmem [resolvable:$true] %s16_s16 }
   0x2   :  { %19 = dma.hbm_to_vmem [thread:$0]  %s15_s14, 16, %s17_s16, [#allocation7]  }
   0x3   :  { %549 = dma.done.wait [#allocation7], 16  }
   0x4   :  { %550 = vsyncadd [#allocation7], 4294967280  ;;  %s35_s19 = sshll.u32 %s636_s0, 4  ;;  %s564_s20 = smov [#allocation2]   ;;  %v600_v0 = vld [vmem:[#allocation6] sm:$0x1]  ;;  %s36_s19 = int_to_ptr.hbm [resolvable:$true] %s35_s19 }
   0x5   :  { %s37_s21 = sshll.u32 %s564_s20, 4  ;;  %s41_s24 = scalar_lea.hbm %s636_s0, 5  ;;  %v605_v1 = vld [vmem:[%s638_s2] sm:$0x1]  ;;  %s38_s21 = int_to_ptr.vmem [resolvable:$true] %s37_s21 }
   0x6   :  { %40 = dma.hbm_to_vmem [thread:$0]  %s36_s19, 80, %s38_s21, [#allocation4] }
   0x7   :  { %s51_s1 = sshll.u32 %s41_s24, 4  ;;  %s565_s25 = smov [#allocation2 + $0x8]   ;;  %s52_s1 = int_to_ptr.hbm [resolvable:$true] %s51_s1 }
   0x8   :  { %s53_s26 = sshll.u32 %s565_s25, 4  ;;  %s54_s26 = int_to_ptr.vmem [resolvable:$true] %s53_s26 }
   0x9   :  { %56 = dma.hbm_to_vmem [thread:$0]  %s52_s1, 128, %s54_s26, [#allocation4 + $0x1] }
   0xa   :  { %551 = dma.done.wait [#allocation4], 80 }
   0xb   :  { %552 = vsyncadd [#allocation4], 4294967216  ;;  %s139_s4 = scalar_lea.hbm %s636_s0, 13  ;;  %vm61_vm0 = vcmask 1044480   ;;  %v60_v2 = vld [vmem:[#allocation2] sm:$0x1f] }
   0xc   :  { %s147_s5 = sshll.u32 %s139_s4, 4  ;;  %v62_v3 = vsel %vm61_vm0, %v60_v2, 0.0  ;;  %v566_v6 = vmov 4.0   ;;  %s567_s0 = smov [#allocation3]   ;;  %s148_s5 = int_to_ptr.hbm [resolvable:$true] %s147_s5 }
   0xd   :  { %152 = dma.hbm_to_vmem [thread:$0]  %s148_s5, 48, %s38_s21, [#allocation4]  ;;  %v63_v4 = vrot.slane %v62_v3, 4  ;;  %363 = vrcp.f32 %v566_v6 }
   0xe   :  { %s614_s2 = sshll.u32 %s567_s0, 4  ;;  %s135_s8 = sshll.u32 %s639_s3, 4  ;;  %s134_s2 = int_to_ptr.vmem [resolvable:$true] %s614_s2  ;;  %s136_s8 = int_to_ptr.hbm [resolvable:$true] %s135_s8 }
   0xf   :  { %v64_v5 = vadd.f32 %v63_v4, %v62_v3 }
  0x11   :  { %v65_v7 = vrot.slane %v64_v5, 2 }
  0x13   :  { %v66_v8 = vadd.f32 %v65_v7, %v64_v5  ;;  %v364_v10 = vpop.eup %363 }
  0x14   :  { %v80_v13 = vmul.f32 4.0, %v364_v10  ;;  %vm84_vm1 = vweird.f32 %v364_v10 }
  0x15   :  { %v67_v9 = vrot.slane %v66_v8, 1 }
  0x16   :  { %v81_v16 = vsub.f32 1.0, %v80_v13 }
  0x17   :  { %v68_v11 = vadd.f32 %v67_v9, %v66_v8 }
  0x18   :  { %v82_v19 = vmul.f32 %v364_v10, %v81_v16 }
  0x19   :  { %v69_v12 = vmul.f32 0.2, %v68_v11 }
  0x1a   :  { %v83_v22 = vadd.f32 %v364_v10, %v82_v19 }
  0x1b   :  { %v70_v14 = vsub.f32 %v60_v2, %v69_v12 }
  0x1c   :  { %v85_v25 = vsel %vm84_vm1, %v364_v10, %v83_v22 }
  0x1d   :  { %v71_v15 = vmul.f32 %v70_v14, %v70_v14 }
  0x1f   :  { %v72_v17 = vsel %vm61_vm0, %v71_v15, 0.0 }
  0x20   :  { %v73_v18 = vrot.slane %v72_v17, 4 }
  0x22   :  { %v74_v20 = vadd.f32 %v73_v18, %v72_v17 }
  0x24   :  { %v75_v21 = vrot.slane %v74_v20, 2 }
  0x26   :  { %v76_v23 = vadd.f32 %v75_v21, %v74_v20 }
  0x28   :  { %v77_v24 = vrot.slane %v76_v23, 1 }
  0x2a   :  { %v78_v26 = vadd.f32 %v77_v24, %v76_v23 }
  0x2c   :  { %v86_v27 = vmul.f32 %v85_v25, %v78_v26 }
  0x2e   :  { %365 = vrsqrt.f32 %v86_v27  ;;  %vm94_vm2 = vcmp.eq.f32.partialorder %v86_v27, inf  ;;  %v97_v34 = vand.u32 2147483648, %v86_v27  ;;  %vm96_vm3 = vcmp.eq.f32.partialorder %v86_v27, 0.0 }
  0x34   :  { %v366_v28 = vpop.eup %365 }
  0x35   :  { %v88_v29 = vmul.f32 %v366_v28, %v86_v27 }
  0x37   :  { %v89_v30 = vmul.f32 %v366_v28, %v88_v29 }
  0x39   :  { %v90_v31 = vmul.f32 0.5, %v89_v30 }
  0x3b   :  { %v91_v32 = vsub.f32 1.5, %v90_v31 }
  0x3d   :  { %v92_v33 = vmul.f32 %v366_v28, %v91_v32 }
  0x3f   :  { %v93_v35 = vmul.f32 %v92_v33, %v86_v27 }
  0x41   :  { %v95_v36 = vsel %vm94_vm2, %v86_v27, %v93_v35 }
  0x42   :  { %v98_v37 = vsel %vm96_vm3, %v97_v34, %v95_v36 }
  0x43   :  { %v99_v38 = vadd.f32 1e-05, %v98_v37 }
  0x45   :  { %367 = vrcp.f32 %v99_v38  ;;  %v111_v41 = vand.u32 2147483648, %v99_v38  ;;  %vm105_vm4 = vweird.f32 %v99_v38  ;;  %v109_v43 = vand.u32 2147483647, %v99_v38 }
  0x47   :  { %v112_v45 = vor.u32 1.1754944e-38, %v111_v41  ;;  %vm110_vm7 = vcmp.eq.f32.partialorder %v109_v43, 8.507059e+37 }
  0x4b   :  { %v368_v39 = vpop.eup %367 }
  0x4c   :  { %v101_v40 = vmul.f32 %v368_v39, %v99_v38  ;;  %vm106_vm5 = vweird.f32 %v368_v39 }
  0x4d   :  { %vm107_vm6 = vmor %vm105_vm4, %vm106_vm5 }
  0x4e   :  { %v102_v42 = vsub.f32 1.0, %v101_v40 }
  0x50   :  { %v103_v44 = vmul.f32 %v368_v39, %v102_v42 }
  0x52   :  { %v104_v46 = vadd.f32 %v368_v39, %v103_v44 }
  0x54   :  { %v108_v47 = vsel %vm107_vm6, %v368_v39, %v104_v46 }
  0x55   :  { %v113_v48 = vsel %vm110_vm7, %v112_v45, %v108_v47 }
  0x56   :  { %v114_v49 = vmul.f32 %v113_v48, %v600_v0 }
  0x58   :  { %v115_v50 = vmul.f32 %v114_v49, %v69_v12  ;;  %v118_v51 = vperm.slane %v114_v49, 0 }
  0x5a   :  { %v116_v52 = vsub.f32 %v605_v1, %v115_v50  ;;  %v120_v53 = vmul.f32 %v118_v51, %v60_v2 }
  0x5c   :  { %v122_v54 = vperm.slane %v116_v52, 0 }
  0x5e   :  { %v124_v55 = vadd.f32 %v122_v54, %v120_v53 }
  0x60   :  { %125 = vst [vmem:[#allocation3] sm:$0x1f] %v124_v55 }
  0x61   :  { %138 = dma.vmem_to_hbm [thread:$0]  %s134_s2, 80, %s136_s8, [#allocation5] }
  0x62   :  { %553 = dma.done.wait [#allocation4 + $0x1], 128 }
  0x63   :  { %554 = vsyncadd [#allocation4 + $0x1], 4294967168  ;;  %v156_v56 = vld [vmem:[#allocation2 + $0x8] sm:$0xff]  ;;  %v568_v59 = vmov 7.0   ;;  %s220_s11 = scalar_lea.hbm %s639_s3, 5  ;;  %s569_s12 = smov [#allocation3 + $0x8]  }
  0x64   :  { %v157_v57 = vrot.slane %v156_v56, 4  ;;  %369 = vrcp.f32 %v568_v59  ;;  %s229_s13 = sshll.u32 %s569_s12, 4  ;;  %s231_s14 = sshll.u32 %s220_s11, 4  ;;  %s230_s13 = int_to_ptr.vmem [resolvable:$true] %s229_s13  ;;  %s232_s14 = int_to_ptr.hbm [resolvable:$true] %s231_s14 }
  0x66   :  { %v158_v58 = vadd.f32 %v157_v57, %v156_v56 }
  0x68   :  { %v159_v60 = vrot.slane %v158_v58, 2 }
  0x6a   :  { %v160_v61 = vadd.f32 %v159_v60, %v158_v58  ;;  %v370_v62 = vpop.eup %369 }
  0x6b   :  { %v173_v3 = vmul.f32 7.0, %v370_v62  ;;  %vm177_vm8 = vweird.f32 %v370_v62 }
  0x6c   :  { %v161_v63 = vrot.slane %v160_v61, 1 }
  0x6d   :  { %v174_v6 = vsub.f32 1.0, %v173_v3 }
  0x6e   :  { %v162_v2 = vadd.f32 %v161_v63, %v160_v61 }
  0x6f   :  { %v175_v9 = vmul.f32 %v370_v62, %v174_v6 }
  0x70   :  { %v163_v4 = vmul.f32 0.125, %v162_v2 }
  0x71   :  { %v176_v12 = vadd.f32 %v370_v62, %v175_v9 }
  0x72   :  { %v164_v5 = vsub.f32 %v156_v56, %v163_v4 }
  0x73   :  { %v178_v15 = vsel %vm177_vm8, %v370_v62, %v176_v12 }
  0x74   :  { %v165_v7 = vmul.f32 %v164_v5, %v164_v5 }
  0x76   :  { %v166_v8 = vrot.slane %v165_v7, 4 }
  0x78   :  { %v167_v10 = vadd.f32 %v166_v8, %v165_v7 }
  0x7a   :  { %v168_v11 = vrot.slane %v167_v10, 2 }
  0x7c   :  { %v169_v13 = vadd.f32 %v168_v11, %v167_v10 }
  0x7e   :  { %v170_v14 = vrot.slane %v169_v13, 1 }
  0x80   :  { %v171_v16 = vadd.f32 %v170_v14, %v169_v13 }
  0x82   :  { %v179_v17 = vmul.f32 %v178_v15, %v171_v16 }
  0x84   :  { %371 = vrsqrt.f32 %v179_v17  ;;  %vm187_vm9 = vcmp.eq.f32.partialorder %v179_v17, inf  ;;  %v190_v24 = vand.u32 2147483648, %v179_v17  ;;  %vm189_vm10 = vcmp.eq.f32.partialorder %v179_v17, 0.0 }
  0x8a   :  { %v372_v18 = vpop.eup %371 }
  0x8b   :  { %v181_v19 = vmul.f32 %v372_v18, %v179_v17 }
  0x8d   :  { %v182_v20 = vmul.f32 %v372_v18, %v181_v19 }
  0x8f   :  { %v183_v21 = vmul.f32 0.5, %v182_v20 }
  0x91   :  { %v184_v22 = vsub.f32 1.5, %v183_v21 }
  0x93   :  { %v185_v23 = vmul.f32 %v372_v18, %v184_v22 }
  0x95   :  { %v186_v25 = vmul.f32 %v185_v23, %v179_v17 }
  0x97   :  { %v188_v26 = vsel %vm187_vm9, %v179_v17, %v186_v25 }
  0x98   :  { %v191_v27 = vsel %vm189_vm10, %v190_v24, %v188_v26 }
  0x99   :  { %v192_v28 = vadd.f32 1e-05, %v191_v27 }
  0x9b   :  { %373 = vrcp.f32 %v192_v28  ;;  %v204_v31 = vand.u32 2147483648, %v192_v28  ;;  %vm198_vm11 = vweird.f32 %v192_v28  ;;  %v202_v33 = vand.u32 2147483647, %v192_v28 }
  0x9d   :  { %v205_v35 = vor.u32 1.1754944e-38, %v204_v31  ;;  %vm203_vm14 = vcmp.eq.f32.partialorder %v202_v33, 8.507059e+37 }
  0xa1   :  { %v374_v29 = vpop.eup %373 }
  0xa2   :  { %v194_v30 = vmul.f32 %v374_v29, %v192_v28  ;;  %vm199_vm12 = vweird.f32 %v374_v29 }
  0xa3   :  { %vm200_vm13 = vmor %vm198_vm11, %vm199_vm12 }
  0xa4   :  { %v195_v32 = vsub.f32 1.0, %v194_v30 }
  0xa6   :  { %v196_v34 = vmul.f32 %v374_v29, %v195_v32 }
  0xa8   :  { %v197_v36 = vadd.f32 %v374_v29, %v196_v34 }
  0xaa   :  { %v201_v37 = vsel %vm200_vm13, %v374_v29, %v197_v36 }
  0xab   :  { %v206_v38 = vsel %vm203_vm14, %v205_v35, %v201_v37 }
  0xac   :  { %v207_v39 = vmul.f32 %v206_v38, %v600_v0 }
  0xae   :  { %v208_v40 = vmul.f32 %v207_v39, %v163_v4  ;;  %v211_v41 = vperm.slane %v207_v39, 0 }
  0xb0   :  { %v209_v42 = vsub.f32 %v605_v1, %v208_v40  ;;  %v213_v43 = vmul.f32 %v211_v41, %v156_v56 }
  0xb2   :  { %v215_v44 = vperm.slane %v209_v42, 0 }
  0xb4   :  { %v217_v45 = vadd.f32 %v215_v44, %v213_v43 }
  0xb6   :  { %219 = vst [vmem:[#allocation3 + $0x8] sm:$0xff] %v217_v45 }
  0xb7   :  { %234 = dma.vmem_to_hbm [thread:$0]  %s230_s13, 128, %s232_s14, [#allocation5 + $0x1] }
  0xb8   :  { %555 = dma.done.wait [#allocation5], 80 }
  0xb9   :  { %556 = vsyncadd [#allocation5], 4294967216 }
  0xba   :  { %557 = dma.done.wait [#allocation4], 48 }
  0xbb   :  { %558 = vsyncadd [#allocation4], 4294967248  ;;  %vm241_vm15 = vcmask 1042432   ;;  %v240_v46 = vld [vmem:[#allocation2] sm:$0x7]  ;;  %v570_v50 = vmov 2.0  }
  0xbc   :  { %v242_v47 = vsel %vm241_vm15, %v240_v46, 0.0  ;;  %375 = vrcp.f32 %v570_v50  ;;  %s306_s17 = scalar_lea.hbm %s639_s3, 13 }
  0xbd   :  { %v243_v48 = vrot.slane %v242_v47, 4  ;;  %s316_s18 = sshll.u32 %s306_s17, 4  ;;  %s317_s18 = int_to_ptr.hbm [resolvable:$true] %s316_s18 }
  0xbf   :  { %v244_v49 = vadd.f32 %v243_v48, %v242_v47 }
  0xc1   :  { %v245_v51 = vrot.slane %v244_v49, 2 }
  0xc2   :  { %v376_v54 = vpop.eup %375 }
  0xc3   :  { %v246_v52 = vadd.f32 %v245_v51, %v244_v49  ;;  %v260_v57 = vmul.f32 2.0, %v376_v54  ;;  %vm264_vm0 = vweird.f32 %v376_v54 }
  0xc5   :  { %v247_v53 = vrot.slane %v246_v52, 1  ;;  %v261_v60 = vsub.f32 1.0, %v260_v57 }
  0xc7   :  { %v248_v55 = vadd.f32 %v247_v53, %v246_v52  ;;  %v262_v63 = vmul.f32 %v376_v54, %v261_v60 }
  0xc9   :  { %v249_v56 = vmul.f32 0.33333334, %v248_v55  ;;  %v263_v4 = vadd.f32 %v376_v54, %v262_v63 }
  0xcb   :  { %v250_v58 = vsub.f32 %v240_v46, %v249_v56  ;;  %v265_v7 = vsel %vm264_vm0, %v376_v54, %v263_v4 }
  0xcd   :  { %v251_v59 = vmul.f32 %v250_v58, %v250_v58 }
  0xcf   :  { %v252_v61 = vsel %vm241_vm15, %v251_v59, 0.0 }
  0xd0   :  { %v253_v62 = vrot.slane %v252_v61, 4 }
  0xd2   :  { %v254_v2 = vadd.f32 %v253_v62, %v252_v61 }
  0xd4   :  { %v255_v3 = vrot.slane %v254_v2, 2 }
  0xd6   :  { %v256_v5 = vadd.f32 %v255_v3, %v254_v2 }
  0xd8   :  { %v257_v6 = vrot.slane %v256_v5, 1 }
  0xda   :  { %v258_v8 = vadd.f32 %v257_v6, %v256_v5 }
  0xdc   :  { %v266_v9 = vmul.f32 %v265_v7, %v258_v8 }
  0xde   :  { %377 = vrsqrt.f32 %v266_v9  ;;  %vm274_vm1 = vcmp.eq.f32.partialorder %v266_v9, inf  ;;  %v277_v16 = vand.u32 2147483648, %v266_v9  ;;  %vm276_vm2 = vcmp.eq.f32.partialorder %v266_v9, 0.0 }
  0xe4   :  { %v378_v10 = vpop.eup %377 }
  0xe5   :  { %v268_v11 = vmul.f32 %v378_v10, %v266_v9 }
  0xe7   :  { %v269_v12 = vmul.f32 %v378_v10, %v268_v11 }
  0xe9   :  { %v270_v13 = vmul.f32 0.5, %v269_v12 }
  0xeb   :  { %v271_v14 = vsub.f32 1.5, %v270_v13 }
  0xed   :  { %v272_v15 = vmul.f32 %v378_v10, %v271_v14 }
  0xef   :  { %v273_v17 = vmul.f32 %v272_v15, %v266_v9 }
  0xf1   :  { %v275_v18 = vsel %vm274_vm1, %v266_v9, %v273_v17 }
  0xf2   :  { %v278_v19 = vsel %vm276_vm2, %v277_v16, %v275_v18 }
  0xf3   :  { %v279_v20 = vadd.f32 1e-05, %v278_v19 }
  0xf5   :  { %379 = vrcp.f32 %v279_v20  ;;  %v291_v23 = vand.u32 2147483648, %v279_v20  ;;  %vm285_vm3 = vweird.f32 %v279_v20  ;;  %v289_v25 = vand.u32 2147483647, %v279_v20 }
  0xf7   :  { %v292_v27 = vor.u32 1.1754944e-38, %v291_v23  ;;  %vm290_vm6 = vcmp.eq.f32.partialorder %v289_v25, 8.507059e+37 }
  0xfb   :  { %v380_v21 = vpop.eup %379 }
  0xfc   :  { %v281_v22 = vmul.f32 %v380_v21, %v279_v20  ;;  %vm286_vm4 = vweird.f32 %v380_v21 }
  0xfd   :  { %vm287_vm5 = vmor %vm285_vm3, %vm286_vm4 }
  0xfe   :  { %v282_v24 = vsub.f32 1.0, %v281_v22 }
 0x100   :  { %v283_v26 = vmul.f32 %v380_v21, %v282_v24 }
 0x102   :  { %v284_v28 = vadd.f32 %v380_v21, %v283_v26 }
 0x104   :  { %v288_v29 = vsel %vm287_vm5, %v380_v21, %v284_v28 }
 0x105   :  { %v293_v30 = vsel %vm290_vm6, %v292_v27, %v288_v29 }
 0x106   :  { %v294_v31 = vmul.f32 %v293_v30, %v600_v0 }
 0x108   :  { %v295_v32 = vmul.f32 %v294_v31, %v249_v56  ;;  %v298_v33 = vperm.slane %v294_v31, 0 }
 0x10a   :  { %v296_v34 = vsub.f32 %v605_v1, %v295_v32  ;;  %v300_v35 = vmul.f32 %v298_v33, %v240_v46 }
 0x10c   :  { %v302_v36 = vperm.slane %v296_v34, 0 }
 0x10e   :  { %v304_v37 = vadd.f32 %v302_v36, %v300_v35 }
 0x110   :  { %305 = vst [vmem:[#allocation3] sm:$0x7] %v304_v37 }
 0x111   :  { %319 = dma.vmem_to_hbm [thread:$0]  %s134_s2, 48, %s317_s18, [#allocation5] }
 0x112   :  { %559 = dma.done.wait [#allocation5 + $0x1], 128 }
 0x113   :  { %560 = vsyncadd [#allocation5 + $0x1], 4294967168 }
 0x114   :  { %561 = dma.done.wait [#allocation5], 48 }
 0x115   :  { %562 = vsyncadd [#allocation5], 4294967248 }
 0x116   :  { %324 = vsyncpa [#allocation7], 1 }
 0x117   :  { %325 = vsyncmov [#allocation4] }
 0x11a   :  { %s326_s19 = vpop.sfrf %325 }
 0x11b   :  { %p351_p0 = scmp.ne.s32.totalorder %s326_s19, 0 }
 0x11d   :  { %330 = shalt.err (%p351_p0)  }
 0x11e   :  { %332 = vsyncmov [#allocation4 + $0x1] }
 0x121   :  { %s333_s3 = vpop.sfrf %332 }
 0x122   :  { %p352_p1 = scmp.ne.s32.totalorder %s333_s3, 0 }
 0x124   :  { %337 = shalt.err (%p352_p1)  }
 0x125   :  { %338 = vsyncmov [#allocation5] }
 0x128   :  { %s339_s20 = vpop.sfrf %338 }
 0x129   :  { %p353_p2 = scmp.ne.s32.totalorder %s339_s20, 0 }
 0x12b   :  { %343 = shalt.err (%p353_p2)  }
 0x12c   :  { %345 = vsyncmov [#allocation5 + $0x1] }
 0x12f   :  { %s346_s21 = vpop.sfrf %345 }
 0x130   :  { %p354_p3 = scmp.ne.s32.totalorder %s346_s21, 0 }
 0x132   :  { %350 = shalt.err (%p354_p3)  }

</bundles_post_ra>
